<compile_context>
chip_gen: v7x
topology: tpu7x:2x2x1
jax: 0.10.0
libtpu: 0.0.40
codegen_flags: <defaults>
</compile_context>

<pallas_src>
import jax
import jax.numpy as jnp
from jax.experimental import pallas as pl
from jax.experimental.pallas import tpu as pltpu


# (tile_rows, 128) f32 slab per feature = tile_rows * 512 B; 2048 rows -> 1 MiB.
# Double-buffered in + out blocks ~= 3 MiB VMEM: safe on v5e/v6e/v7x defaults.
MAX_TILE_ROWS = 2048


def _affine_kernel(coef_ref, x_ref, o_ref):
    """coef_ref: (3,) f32 in SMEM = [w0, w1, b_eff]
       x_ref:    (2, TILE_ROWS, 128) f32 in VMEM (feature-major dense slabs)
       o_ref:    (TILE_ROWS, 128) f32 in VMEM
    """
    w0 = coef_ref[0]
    w1 = coef_ref[1]
    b = coef_ref[2]
    # Pure VPU FMA over fully dense (rows, 128) vregs.
    o_ref[...] = x_ref[0] * w0 + x_ref[1] * w1 + b


def collapse_params(params):
    """Collapse the 4 activation-free Linear layers into 3 scalars [w0, w1, b].

    Call once per parameter set (hoisted out of the per-batch forward).
    out = x @ (W1^T W2^T W3^T W4^T) + (((b1 W2^T + b2) W3^T + b3) W4^T + b4)
    """
    (w1, b1), (w2, b2), (w3, b3), (w4, b4) = params
    w_eff = w1.T @ w2.T @ w3.T @ w4.T                      # (2, 1)
    b_eff = ((b1 @ w2.T + b2) @ w3.T + b3) @ w4.T + b4     # (1,)
    return jnp.concatenate([w_eff[:, 0], b_eff]).astype(jnp.float32)  # (3,)


@jax.jit
def circle_model_forward(x, coeffs):
    """Forward pass of CircleModel given pre-collapsed coefficients.

    x:      (N, 2) float32 points
    coeffs: (3,)   float32 = [w0, w1, b_eff] from collapse_params(params)
    returns (N, 1) float32 logits (same as layer_4(layer_3(layer_2(layer_1(x))))).
    """
    x = x.astype(jnp.float32)
    N = x.shape[0]

    # ---- dense (rows, 128) slab layout, tiled over rows ----
    rows = pl.cdiv(N, 128)
    grid_steps = pl.cdiv(rows, MAX_TILE_ROWS)
    tile_rows = 8 * pl.cdiv(pl.cdiv(rows, grid_steps), 8)   # multiple of 8 sublanes
    padded_rows = tile_rows * grid_steps
    n_pad = padded_rows * 128

    # Feature-major slabs: (2, padded_rows, 128); batch index = row*128 + lane.
    xt = jnp.pad(x.T, ((0, 0), (0, n_pad - N)))
    x3 = xt.reshape(2, padded_rows, 128)

    out = pl.pallas_call(
        _affine_kernel,
        out_shape=jax.ShapeDtypeStruct((padded_rows, 128), jnp.float32),
        grid=(grid_steps,),
        in_specs=[
            pl.BlockSpec(memory_space=pltpu.MemorySpace.SMEM),      # coeffs (whole)
            pl.BlockSpec((2, tile_rows, 128), lambda i: (0, i, 0)),  # x slab tile
        ],
        out_specs=pl.BlockSpec((tile_rows, 128), lambda i: (i, 0)),
        compiler_params=pltpu.CompilerParams(
            dimension_semantics=("parallel",),
        ),
    )(coeffs, x3)

    # Back to the PyTorch output layout (N, 1); fuses inside the jit.
    return out.reshape(n_pad)[:N].reshape(N, 1)


def init_circle_model_params(key):
    """Deterministic init matching PyTorch nn.Linear default (uniform +/- 1/sqrt(fan_in))."""
    dims = [(2, 16), (16, 16), (16, 16), (16, 1)]
    params = []
    for (fan_in, fan_out) in dims:
        key, kw, kb = jax.random.split(key, 3)
        bound = 1.0 / jnp.sqrt(jnp.float32(fan_in))
        w = jax.random.uniform(kw, (fan_out, fan_in), jnp.float32, -bound, bound)
        b = jax.random.uniform(kb, (fan_out,), jnp.float32, -bound, bound)
        params.append((w, b))
    return params


def _reference_forward(x, params):
    h = x
    for (w, b) in params:
        h = h @ w.T + b
    return h


if __name__ == "__main__":
    key = jax.random.PRNGKey(0)
    key, kx = jax.random.split(key)

    N = 1024  # small batch of 2-D "circle" points
    x = jax.random.normal(kx, (N, 2), jnp.float32)

    params = init_circle_model_params(key)

    # Hoisted: collapse the 4 layers into 3 coefficients once per parameter set.
    coeffs = jax.block_until_ready(collapse_params(params))

    out = circle_model_forward(x, coeffs)
    out = jax.block_until_ready(out)

    ref = _reference_forward(x, params)
    assert out.shape == (N, 1)
    assert jnp.allclose(out, ref, atol=1e-4, rtol=1e-4), "Pallas output mismatch vs reference"

    print("KERNEL_OK")
</pallas_src>

<mosaic_0001>
module attributes {stable_mosaic.version = 11 : i64} {
  func.func @_affine_kernel(%arg0: i32, %arg1: memref<3xf32, #tpu.memory_space<smem>>, %arg2: memref<2x8x128xf32, #tpu.memory_space<vmem>>, %arg3: memref<8x128xf32, #tpu.memory_space<vmem>>) attributes {dimension_semantics = [#tpu.dimension_semantics<parallel>], iteration_bounds = array<i64: 1>, scalar_prefetch = 0 : i64, scratch_operands = 0 : i64, tpu.core_type = #tpu.core_type<tc>, window_params = [{transform_indices = @transform_0, window_bounds = array<i64: 3>}, {transform_indices = @transform_1, window_bounds = array<i64: 2, 8, 128>}, {transform_indices = @transform_2, window_bounds = array<i64: 8, 128>}]} {
    %c0 = arith.constant 0 : index
    %0 = memref.load %arg1[%c0] : memref<3xf32, #tpu.memory_space<smem>>
    %c1 = arith.constant 1 : index
    %1 = memref.load %arg1[%c1] : memref<3xf32, #tpu.memory_space<smem>>
    %c2 = arith.constant 2 : index
    %2 = memref.load %arg1[%c2] : memref<3xf32, #tpu.memory_space<smem>>
    %c0_0 = arith.constant 0 : index
    %c0_1 = arith.constant 0 : index
    %c0_2 = arith.constant 0 : index
    %3 = vector.load %arg2[%c0_0, %c0_1, %c0_2] : memref<2x8x128xf32, #tpu.memory_space<vmem>>, vector<1x8x128xf32>
    %4 = vector.shape_cast %3 : vector<1x8x128xf32> to vector<8x128xf32>
    %5 = vector.broadcast %0 : f32 to vector<8x128xf32>
    %6 = arith.mulf %4, %5 : vector<8x128xf32>
    %c1_3 = arith.constant 1 : index
    %c0_4 = arith.constant 0 : index
    %c0_5 = arith.constant 0 : index
    %7 = vector.load %arg2[%c1_3, %c0_4, %c0_5] : memref<2x8x128xf32, #tpu.memory_space<vmem>>, vector<1x8x128xf32>
    %8 = vector.shape_cast %7 : vector<1x8x128xf32> to vector<8x128xf32>
    %9 = vector.broadcast %1 : f32 to vector<8x128xf32>
    %10 = arith.mulf %8, %9 : vector<8x128xf32>
    %11 = arith.addf %6, %10 : vector<8x128xf32>
    %12 = vector.broadcast %2 : f32 to vector<8x128xf32>
    %13 = arith.addf %11, %12 : vector<8x128xf32>
    %c0_6 = arith.constant 0 : index
    %c0_7 = arith.constant 0 : index
    %14 = vector.load %arg3[%c0_6, %c0_7] : memref<8x128xf32, #tpu.memory_space<vmem>>, vector<8x128xf32>
    tpu.vector_store %arg3[%c0_6, %c0_7], %13 {strides = array<i32>} : memref<8x128xf32, #tpu.memory_space<vmem>>, vector<8x128xf32>,
    return
  }
  func.func @transform_0(%arg0: i32) -> i32 {
    %c0_i32 = arith.constant 0 : i32
    %c0_i32_0 = arith.constant 0 : i32
    return %c0_i32 : i32
  }
  func.func @transform_1(%arg0: i32) -> (i32, i32, i32) {
    %c0_i32 = arith.constant 0 : i32
    %c0_i32_0 = arith.constant 0 : i32
    %c0_i32_1 = arith.constant 0 : i32
    return %c0_i32, %arg0, %c0_i32_0 : i32, i32, i32
  }
  func.func @transform_2(%arg0: i32) -> (i32, i32) {
    %c0_i32 = arith.constant 0 : i32
    %c0_i32_0 = arith.constant 0 : i32
    return %arg0, %c0_i32 : i32, i32
  }
}

</mosaic_0001>

<bundles_post_ra>
// kernel: circle_model_forward.1
= control target key start
LH: loop header
LB: loop body
LE: loop exit
PB: predicated region body
PF: predicated region fallthrough
CT: control target
= control target key end

     0   :  { %7 = vsyncpa [#allocation4], 0  ;;  %s135_s0 = inlined_call_operand.vmem [shape: f32[3], index: 0, kind: input, shape index: {}]   ;;  %s136_s1 = inlined_call_operand.vmem [shape: f32[2,8,128], index: 1, kind: input, shape index: {}]   ;;  %s137_s2 = inlined_call_operand.hbm [shape: f32[8,128], index: 2, kind: output, shape index: {}]  }
   0x1   :  { %8 = vsyncpa [#allocation3], 0  ;;  %s15_s11 = sshll.u32 %s135_s0, 4  ;;  %s16_s11 = int_to_ptr.vmem [resolvable:$true] %s15_s11 }
   0x2   :  { %s59_s12 = scalar_lea.vmem %s16_s11, 16  ;;  %p64_p1 = scmp.lt.s32.totalorder %s16_s11, %s16_s11 }
   0x3   :  { %p60_p0 = scmp.ne.s32.totalorder %s16_s11, %s59_s12  ;;  %p65_p2 = scmp.lt.s32.totalorder %s59_s12, %s59_s12 }
   0x5   :  { %p66_p3 = por %p65_p2, %p64_p1 }
   0x7   :  { %p67_p4 = pnand %p66_p3, %p60_p0 }
   0x9   :  { %70 = shalt.err (!%p67_p4)
}
   0xa   :  { %s97_s13 = smov [#allocation2]  }
   0xb   :  { %18 = dma.vmem_to_smem %s16_s11, 16, %s97_s13, [#allocation4]  }
   0xc   :  { %93 = dma.done.wait [#allocation4], 16  }
   0xd   :  { %94 = vsyncadd [#allocation4], 4294967280 }
   0xe   :  { %24 = sfence }
   0xf   :  { %s25_s14 = sld [smem:[#allocation2]]  ;;  %s54_s15 = sld [smem:[#allocation2 + $0x1]]  ;;  %v28_v0 = vld [vmem:[%s136_s1] sm:$0xff]  ;;  %v56_v1 = vld [vmem:[%s136_s1 + $0x8] sm:$0xff] }
  0x10   :  { %s55_s16 = sld [smem:[#allocation2 + $0x2]]  ;;  %s98_s20 = smov [#allocation5]  }
  0x11   :  { %s45_s21 = sshll.u32 %s98_s20, 4  ;;  %s46_s21 = int_to_ptr.vmem [resolvable:$true] %s45_s21 }
  0x12   :  { %s71_s22 = scalar_lea.vmem %s46_s21, 128  ;;  %p76_p6 = scmp.lt.s32.totalorder %s46_s21, %s46_s21 }
  0x13   :  { %p72_p5 = scmp.ne.s32.totalorder %s46_s21, %s71_s22  ;;  %p77_p7 = scmp.lt.s32.totalorder %s71_s22, %s71_s22 }
  0x15   :  { %v29_v2 = vstv %s25_s14  ;;  %v33_v3 = vstv %s54_s15  ;;  %p78_p8 = por %p77_p7, %p76_p6 }
  0x16   :  { %v30_v4 = vmul.f32 %v29_v2, %v28_v0  ;;  %v34_v5 = vmul.f32 %v56_v1, %v33_v3  ;;  %v36_v6 = vstv %s55_s16 }
  0x17   :  { %p79_p9 = pnand %p78_p8, %p72_p5 }
  0x18   :  { %v35_v7 = vadd.f32 %v34_v5, %v30_v4 }
  0x1a   :  { %v37_v8 = vadd.f32 %v36_v6, %v35_v7 }
  0x1c   :  { %38 = vst [vmem:[#allocation5] sm:$0xff] %v37_v8 }
  0x1d   :  { %82 = shalt.err (!%p79_p9)
}
  0x1e   :  { %s83_s24 = scalar_lea.hbm %s137_s2, 128 }
  0x1f   :  { %p84_p10 = scmp.ne.s32.totalorder %s137_s2, %s83_s24  ;;  %p87_p11 = scmp.lt.u32.totalorder %s83_s24, %s137_s2 }
  0x21   :  { %p89_p12 = pnand %p87_p11, %p84_p10 }
  0x23   :  { %92 = shalt.err (!%p89_p12)
}
  0x24   :  { %48 = dma.vmem_to_hbm [thread:$0]  %s46_s21, 128, %s137_s2, [#allocation3]  }
  0x25   :  { %95 = dma.done.wait [#allocation3], 128  }
  0x26   :  { %96 = vsyncadd [#allocation3], 4294967168 }
  0x27   :  { %52 = vsyncpa [#allocation3], 1 }
  0x28   :  { %53 = vsyncpa [#allocation4], 1 }

</bundles_post_ra>
